<compile_context>
chip_gen: v7x
topology: tpu7x:2x2x1
jax: 0.10.0
libtpu: 0.0.40
codegen_flags: <defaults>
</compile_context>

<pallas_src>
import functools

import jax
import jax.numpy as jnp
import numpy as np
from jax.experimental import pallas as pl
from jax.experimental.pallas import tpu as pltpu


# ------------------------------ kernels ------------------------------------ #

def _norm_relu_kernel(x_ref, w_ref, b_ref, o_ref, *, eps, use_norm):
    # x_ref: (1, C, T) NCHW-native tile; layer-norm over channels (axis=1), then ReLU.
    x = x_ref[...].astype(jnp.float32)
    if use_norm:
        mean = jnp.mean(x, axis=1, keepdims=True)                      # (1, 1, T)
        var = jnp.mean((x - mean) ** 2, axis=1, keepdims=True)         # biased, like F.layer_norm
        y = (x - mean) * jax.lax.rsqrt(var + eps)
        w = w_ref[...].astype(jnp.float32)[None]                       # (1, C, 1)
        b = b_ref[...].astype(jnp.float32)[None]
        y = y * w + b
    else:
        y = x
    o_ref[...] = jnp.maximum(y, 0.0).astype(o_ref.dtype)


def _norm_relu_pool_kernel(x_ref, w_ref, b_ref, o_ref, acc_ref, *,
                           eps, use_norm, hw, thw):
    # x_ref: (1, C, T) spatial tile of one batch element.
    # LN over C (optional), ReLU, running sum over the spatial (lane) axis into acc_ref,
    # divide by HW and store at the last spatial tile.
    j = pl.program_id(1)

    @pl.when(j == 0)
    def _():
        acc_ref[...] = jnp.zeros_like(acc_ref)

    x = x_ref[...].astype(jnp.float32)
    if use_norm:
        mean = jnp.mean(x, axis=1, keepdims=True)
        var = jnp.mean((x - mean) ** 2, axis=1, keepdims=True)
        y = (x - mean) * jax.lax.rsqrt(var + eps)
        w = w_ref[...].astype(jnp.float32)[None]
        b = b_ref[...].astype(jnp.float32)[None]
        y = y * w + b
    else:
        y = x
    y = jnp.maximum(y, 0.0)

    if hw % thw != 0:
        # Last spatial tile is padded past HW: mask the out-of-bounds lanes before summing.
        lane = jax.lax.broadcasted_iota(jnp.int32, y.shape, 2)
        y = jnp.where(j * thw + lane < hw, y, 0.0)

    acc_ref[...] += jnp.sum(y, axis=2, keepdims=True)                  # (1, C, 1)

    @pl.when(j == pl.num_programs(1) - 1)
    def _():
        o_ref[...] = (acc_ref[...] * (1.0 / hw)).astype(o_ref.dtype)


# ------------------------------ wrappers ------------------------------------ #

def _pick_spatial_tile(hw, c, itemsize, target_bytes=2 << 20):
    # Lane tile: multiple of 128, sized for roughly `target_bytes` per (1, C, T) block.
    t = max(128, (target_bytes // max(1, c * itemsize)) // 128 * 128)
    return int(min(t, pl.cdiv(hw, 128) * 128))     # never larger than padded HW


def _compiler_params(block_bytes_f32, semantics):
    # Headroom for double-buffered in/out blocks plus f32 temporaries; safe on v5e/v6e/v7x.
    vmem = int(min(56 << 20, max(32 << 20, 12 * block_bytes_f32)))
    return pltpu.CompilerParams(dimension_semantics=semantics,
                                vmem_limit_bytes=vmem)


def _norm_relu(x, weight, bias, eps, use_norm):
    # x: (N, C, HW) NCHW-native. Output (N, C, HW).
    n, c, hw = x.shape
    t = _pick_spatial_tile(hw, c, x.dtype.itemsize)
    grid = (n, pl.cdiv(hw, t))
    block_bytes_f32 = c * t * 4
    w2 = weight.reshape(c, 1).astype(jnp.float32)
    b2 = bias.reshape(c, 1).astype(jnp.float32)
    return pl.pallas_call(
        functools.partial(_norm_relu_kernel, eps=eps, use_norm=use_norm),
        out_shape=jax.ShapeDtypeStruct((n, c, hw), x.dtype),
        grid_spec=pltpu.PrefetchScalarGridSpec(
            num_scalar_prefetch=0,
            grid=grid,
            in_specs=[
                pl.BlockSpec((1, c, t), lambda i, j: (i, 0, j)),
                pl.BlockSpec((c, 1), lambda i, j: (0, 0)),
                pl.BlockSpec((c, 1), lambda i, j: (0, 0)),
            ],
            out_specs=pl.BlockSpec((1, c, t), lambda i, j: (i, 0, j)),
        ),
        compiler_params=_compiler_params(block_bytes_f32, ("parallel", "parallel")),
    )(x, w2, b2)


def _norm_relu_pool(x, weight, bias, eps, use_norm):
    # x: (N, C, HW) NCHW-native. Output (N, C) (global average over HW after LN+ReLU).
    n, c, hw = x.shape
    t = _pick_spatial_tile(hw, c, x.dtype.itemsize)
    grid = (n, pl.cdiv(hw, t))
    block_bytes_f32 = c * t * 4
    w2 = weight.reshape(c, 1).astype(jnp.float32)
    b2 = bias.reshape(c, 1).astype(jnp.float32)
    out = pl.pallas_call(
        functools.partial(_norm_relu_pool_kernel, eps=eps, use_norm=use_norm,
                          hw=hw, thw=t),
        out_shape=jax.ShapeDtypeStruct((n, c, 1), x.dtype),
        grid_spec=pltpu.PrefetchScalarGridSpec(
            num_scalar_prefetch=0,
            grid=grid,
            in_specs=[
                pl.BlockSpec((1, c, t), lambda i, j: (i, 0, j)),
                pl.BlockSpec((c, 1), lambda i, j: (0, 0)),
                pl.BlockSpec((c, 1), lambda i, j: (0, 0)),
            ],
            out_specs=pl.BlockSpec((1, c, 1), lambda i, j: (i, 0, 0)),
            scratch_shapes=[pltpu.VMEM((1, c, 1), jnp.float32)],
        ),
        compiler_params=_compiler_params(block_bytes_f32, ("parallel", "arbitrary")),
    )(x, w2, b2)
    return out.reshape(n, c)


class ReluNeckPallas:
    """JAX/Pallas port of ReluNeck (norm_cfg={'type':'LN'} or None)."""
    # TODO(synk): frozen_state / init_weights are training-time concerns with no forward effect.

    def __init__(self, in_channels, norm_cfg=None, avgpool=False, eps=1e-5):
        self.in_channels = in_channels
        self.use_norm = norm_cfg is not None and norm_cfg.get("type") == "LN"
        self.avgpool = avgpool
        self.eps = eps
        # LayerNorm1D.reset_parameters(): weight = ones, bias = zeros (deterministic).
        self.weight = jnp.ones((in_channels,), jnp.float32)
        self.bias = jnp.zeros((in_channels,), jnp.float32)

    def __call__(self, x):
        # x: (N, C, H, W) — kept NCHW-native; only free reshapes in the wrapper.
        n, c, h, w = x.shape
        flat = x.reshape(n, c, h * w)
        if self.avgpool:
            return _norm_relu_pool(flat, self.weight, self.bias, self.eps, self.use_norm)
        out = _norm_relu(flat, self.weight, self.bias, self.eps, self.use_norm)
        return out.reshape(n, c, h, w)


# ------------------------------ reference + main ---------------------------- #

def _ref_forward(x, weight, bias, eps, use_norm, avgpool):
    n, c, h, w = x.shape
    y = x
    if use_norm:
        t = jnp.transpose(x.reshape(n, c, h * w), (0, 2, 1))   # (N, HW, C)
        mean = jnp.mean(t, axis=-1, keepdims=True)
        var = jnp.mean((t - mean) ** 2, axis=-1, keepdims=True)
        t = (t - mean) / jnp.sqrt(var + eps)
        t = weight * t + bias
        y = jnp.transpose(t, (0, 2, 1)).reshape(n, c, h, w)
    y = jnp.maximum(y, 0.0)
    if avgpool:
        y = jnp.mean(y, axis=(2, 3))
    return y


if __name__ == "__main__":
    key = jax.random.PRNGKey(0)
    N, C, H, W = 2, 4, 16, 16
    x = jax.random.normal(key, (N, C, H, W), dtype=jnp.float32)

    # Config 1: LN norm + ReLU, no avgpool.
    neck = ReluNeckPallas(C, norm_cfg={"type": "LN"}, avgpool=False)
    out1 = jax.block_until_ready(neck(x))
    ref1 = _ref_forward(x, neck.weight, neck.bias, 1e-5, True, False)
    assert out1.shape == (N, C, H, W)
    np.testing.assert_allclose(np.asarray(out1), np.asarray(ref1), rtol=1e-5, atol=1e-5)

    # Config 2: LN norm + ReLU + AdaptiveAvgPool2d((1,1)) + flatten.
    neck_pool = ReluNeckPallas(C, norm_cfg={"type": "LN"}, avgpool=True)
    out2 = jax.block_until_ready(neck_pool(x))
    ref2 = _ref_forward(x, neck_pool.weight, neck_pool.bias, 1e-5, True, True)
    assert out2.shape == (N, C)
    np.testing.assert_allclose(np.asarray(out2), np.asarray(ref2), rtol=1e-5, atol=1e-5)

    # Config 3: no norm, plain ReLU (module defaults).
    neck_plain = ReluNeckPallas(C, norm_cfg=None, avgpool=False)
    out3 = jax.block_until_ready(neck_plain(x))
    ref3 = _ref_forward(x, neck_plain.weight, neck_plain.bias, 1e-5, False, False)
    assert out3.shape == (N, C, H, W)
    np.testing.assert_allclose(np.asarray(out3), np.asarray(ref3), rtol=1e-6, atol=1e-6)

    # Config 4: no norm, ReLU + avgpool (fused in-kernel pooling).
    neck_plain_pool = ReluNeckPallas(C, norm_cfg=None, avgpool=True)
    out4 = jax.block_until_ready(neck_plain_pool(x))
    ref4 = _ref_forward(x, neck_plain_pool.weight, neck_plain_pool.bias, 1e-5, False, True)
    assert out4.shape == (N, C)
    np.testing.assert_allclose(np.asarray(out4), np.asarray(ref4), rtol=1e-6, atol=1e-6)

    print("KERNEL_OK")
</pallas_src>

<mosaic_0001>
module attributes {stable_mosaic.version = 11 : i64} {
  func.func @_norm_relu_kernel(%arg0: i32, %arg1: i32, %arg2: memref<1x4x256xf32, #tpu.memory_space<vmem>>, %arg3: memref<4x1xf32, #tpu.memory_space<vmem>>, %arg4: memref<4x1xf32, #tpu.memory_space<vmem>>, %arg5: memref<1x4x256xf32, #tpu.memory_space<vmem>>) attributes {dimension_semantics = [#tpu.dimension_semantics<parallel>, #tpu.dimension_semantics<parallel>], iteration_bounds = array<i64: 2, 1>, scalar_prefetch = 0 : i64, scratch_operands = 0 : i64, tpu.core_type = #tpu.core_type<tc>, window_params = [{transform_indices = @transform_0, window_bounds = array<i64: 1, 4, 256>}, {pipeline_mode = #tpu.pipeline_mode<synchronous>, transform_indices = @transform_1, window_bounds = array<i64: 4, 1>}, {pipeline_mode = #tpu.pipeline_mode<synchronous>, transform_indices = @transform_2, window_bounds = array<i64: 4, 1>}, {transform_indices = @transform_3, window_bounds = array<i64: 1, 4, 256>}]} {
    %c0 = arith.constant 0 : index
    %c0_0 = arith.constant 0 : index
    %c0_1 = arith.constant 0 : index
    %0 = vector.load %arg2[%c0, %c0_0, %c0_1] : memref<1x4x256xf32, #tpu.memory_space<vmem>>, vector<1x4x256xf32>
    %cst = arith.constant dense<0.000000e+00> : vector<1x256xf32>
    %1 = vector.multi_reduction <add>, %0, %cst [1] : vector<1x4x256xf32> to vector<1x256xf32>
    %2 = vector.shape_cast %1 : vector<1x256xf32> to vector<1x1x256xf32>
    %cst_2 = arith.constant 4.000000e+00 : f32
    %3 = vector.broadcast %cst_2 : f32 to vector<1x1x256xf32>
    %4 = arith.divf %2, %3 : vector<1x1x256xf32>
    %5 = vector.broadcast %4 : vector<1x1x256xf32> to vector<1x4x256xf32>
    %6 = arith.subf %0, %5 : vector<1x4x256xf32>
    %7 = arith.mulf %6, %6 : vector<1x4x256xf32>
    %cst_3 = arith.constant dense<0.000000e+00> : vector<1x256xf32>
    %8 = vector.multi_reduction <add>, %7, %cst_3 [1] : vector<1x4x256xf32> to vector<1x256xf32>
    %9 = vector.shape_cast %8 : vector<1x256xf32> to vector<1x1x256xf32>
    %cst_4 = arith.constant 4.000000e+00 : f32
    %10 = vector.broadcast %cst_4 : f32 to vector<1x1x256xf32>
    %11 = arith.divf %9, %10 : vector<1x1x256xf32>
    %12 = vector.broadcast %4 : vector<1x1x256xf32> to vector<1x4x256xf32>
    %13 = arith.subf %0, %12 : vector<1x4x256xf32>
    %cst_5 = arith.constant 9.99999974E-6 : f32
    %14 = vector.broadcast %cst_5 : f32 to vector<1x1x256xf32>
    %15 = arith.addf %11, %14 : vector<1x1x256xf32>
    %16 = math.rsqrt %15 : vector<1x1x256xf32>
    %17 = vector.broadcast %16 : vector<1x1x256xf32> to vector<1x4x256xf32>
    %18 = arith.mulf %13, %17 : vector<1x4x256xf32>
    %c0_6 = arith.constant 0 : index
    %c0_7 = arith.constant 0 : index
    %19 = vector.load %arg3[%c0_6, %c0_7] : memref<4x1xf32, #tpu.memory_space<vmem>>, vector<4x1xf32>
    %20 = vector.shape_cast %19 : vector<4x1xf32> to vector<1x4x1xf32>
    %c0_8 = arith.constant 0 : index
    %c0_9 = arith.constant 0 : index
    %21 = vector.load %arg4[%c0_8, %c0_9] : memref<4x1xf32, #tpu.memory_space<vmem>>, vector<4x1xf32>
    %22 = vector.shape_cast %21 : vector<4x1xf32> to vector<1x4x1xf32>
    %23 = vector.broadcast %20 : vector<1x4x1xf32> to vector<1x4x256xf32>
    %24 = arith.mulf %18, %23 : vector<1x4x256xf32>
    %25 = vector.broadcast %22 : vector<1x4x1xf32> to vector<1x4x256xf32>
    %26 = arith.addf %24, %25 : vector<1x4x256xf32>
    %cst_10 = arith.constant 0.000000e+00 : f32
    %27 = vector.broadcast %cst_10 : f32 to vector<1x4x256xf32>
    %28 = arith.maximumf %26, %27 : vector<1x4x256xf32>
    %c0_11 = arith.constant 0 : index
    %c0_12 = arith.constant 0 : index
    %c0_13 = arith.constant 0 : index
    %29 = vector.load %arg5[%c0_11, %c0_12, %c0_13] : memref<1x4x256xf32, #tpu.memory_space<vmem>>, vector<1x4x256xf32>
    tpu.vector_store %arg5[%c0_11, %c0_12, %c0_13], %28 {strides = array<i32>} : memref<1x4x256xf32, #tpu.memory_space<vmem>>, vector<1x4x256xf32>,
    return
  }
  func.func @transform_0(%arg0: i32, %arg1: i32) -> (i32, i32, i32) {
    %c0_i32 = arith.constant 0 : i32
    %c0_i32_0 = arith.constant 0 : i32
    return %arg0, %c0_i32, %arg1 : i32, i32, i32
  }
  func.func @transform_1(%arg0: i32, %arg1: i32) -> (i32, i32) {
    %c0_i32 = arith.constant 0 : i32
    %c0_i32_0 = arith.constant 0 : i32
    %c0_i32_1 = arith.constant 0 : i32
    return %c0_i32, %c0_i32_0 : i32, i32
  }
  func.func @transform_2(%arg0: i32, %arg1: i32) -> (i32, i32) {
    %c0_i32 = arith.constant 0 : i32
    %c0_i32_0 = arith.constant 0 : i32
    %c0_i32_1 = arith.constant 0 : i32
    return %c0_i32, %c0_i32_0 : i32, i32
  }
  func.func @transform_3(%arg0: i32, %arg1: i32) -> (i32, i32, i32) {
    %c0_i32 = arith.constant 0 : i32
    %c0_i32_0 = arith.constant 0 : i32
    return %arg0, %c0_i32, %arg1 : i32, i32, i32
  }
}

</mosaic_0001>

<bundles_post_ra>
// kernel: tpu_custom_call.1
= control target key start
LH: loop header
LB: loop body
LE: loop exit
PB: predicated region body
PF: predicated region fallthrough
CT: control target
= control target key end

     0   :  { %8 = vsyncpa [#allocation3], 0  ;;  %s805_s0 = inlined_call_operand.hbm [shape: f32[2,4,256], index: 0, kind: input, shape index: {}]   ;;  %s806_s1 = inlined_call_operand.vmem [shape: f32[4,1], index: 1, kind: input, shape index: {}]   ;;  %s807_s2 = inlined_call_operand.vmem [shape: f32[4,1], index: 2, kind: input, shape index: {}]   ;;  %s808_s3 = inlined_call_operand.hbm [shape: f32[2,4,256], index: 3, kind: output, shape index: {}]  }
   0x1   :  { %10 = vsyncpa [#allocation3 + $0x1], 0 }
   0x2   :  { %11 = vsyncpa [#allocation4], 0 }
   0x3   :  { %13 = vsyncpa [#allocation4 + $0x1], 0  ;;  %s619_s12 = smov 0   ;;  %s621_s13 = smov 0  }
   0x4   :  { %s623_s14 = smov 0   ;;  %s625_s15 = smov 0  }
   0x5   :  { %s627_s16 = smov 0   ;;  %s629_s17 = smov 0  }
   0x6 LB: > { %s394_s18 = sadd.s32 4294967295, %s593_s17   ;;  %s395_s19 = sadd.s32 4294967294, %s593_s17   ;;  %s593_s17 = sphi %s629_s17, %s19_s17   ;;  %s589_s16 = sphi %s627_s16, %s824_s16   ;;  %s585_s15 = sphi %s625_s15, %s823_s15   ;;  %s581_s14 = sphi %s623_s14, %s822_s14   ;;  %s577_s13 = sphi %s621_s13, %s821_s13   ;;  %s573_s12 = sphi %s619_s12, %s820_s12  }
   0x7   : > { %s31_s20 = sadd.s32 1, %s589_s16  ;;  %s40_s21 = sadd.s32 1, %s581_s14 }
   0x8   : > { %p33_p0 = scmp.ge.s32.totalorder %s31_s20, 2  ;;  %p47_p1 = scmp.ne.s32.totalorder %s581_s14, %s577_s13 }
   0x9   : > { %p48_p2 = scmp.eq.s32.totalorder %s593_s17, 0  ;;  %p53_p3 = scmp.ne.s32.totalorder %s577_s13, %s573_s12 }
   0xa   : > { %s826_s20 = smov (%p33_p0, %s31_s20), 0  ;;  %p54_p5 = scmp.eq.s32.totalorder %s394_s18, 0 }
   0xb   : > { %p660_p4 = por %p48_p2, %p47_p1  ;;  %s35_s23 = ssub.s32 %s589_s16, %s826_s20 }
   0xc   : > { %p121_p6 = scmp.eq.s32.totalorder %s394_s18, 1  ;;  %p38_p7 = scmp.eq.s32.totalorder %s35_s23, 0 }
   0xd   : > { %p666_p8 = por %p54_p5, %p53_p3  ;;  %p127_p10 = scmp.eq.s32.totalorder %s395_s19, 1 }
   0xe   : > { %p670_p9 = por %p121_p6, %p47_p1  ;;  %p423_p13 = scmp.lt.s32.totalorder %s593_s17, 2 }
   0xf   : > { %s675_s26 = scalar_select %p38_p7, %s581_s14, %s40_s21  }
  0x10   : > { %s812_s25 = scalar_select %p670_p9, 1, 0 }
  0x11   : > { %p677_p11 = por %p127_p10, %p53_p3  ;;  %s153_s28 = sand.u32 1, %s581_s14  }
  0x12   : > { %s398_s29 = sshll.u32 %s153_s28, 3  ;;  %s409_s30 = sshll.u32 %s589_s16, 7 }
  0x13   : > { %s813_s27 = scalar_select %p677_p11, 1, 0 }
  0x14   : > { %s688_s6 = scalar_lea.hbm %s805_s0, %s409_s30  ;;  %s157_s7 = scalar_lea.vmem [#allocation2], %s398_s29 }
  0x15   : > { %s167_s8 = sshll.u32 %s157_s7, 4  ;;  %p694_p0 = pnand %p423_p13, %p660_p4  ;;  %s690_s8 = int_to_ptr.vmem [resolvable:$true] %s167_s8 }
  0x16   : > { %s154_s10 = scalar_lea.sflag [#allocation3], %s153_s28  ;;  %s481_s11 = scalar_lea.hbm %s688_s6, 128 }
  0x17   : > { %p482_p3 = scmp.ne.s32.totalorder %s688_s6, %s481_s11  ;;  %p483_p5 = pneg %p694_p0 }
  0x18   : > { %s486_s21 = scalar_lea.hbm %s805_s0, 256  ;;  %p487_p4 = scmp.lt.u32.totalorder %s688_s6, %s805_s0 }
  0x19   : > { %p484_p6 = pnand %p483_p5, %p482_p3  ;;  %p488_p10 = scmp.lt.u32.totalorder %s486_s21, %s481_s11 }
  0x1a   : > { %p490_p12 = scmp.lt.u32.totalorder %s481_s11, %s688_s6 }
  0x1b   : > { %p485_p7 = pneg %p484_p6  ;;  %p489_p13 = por %p488_p10, %p487_p4 }
  0x1d   : > { %p491_p1 = por %p490_p12, %p489_p13 }
  0x1f   : > { %p492_p2 = pnand %p491_p1, %p485_p7 }
  0x21   : > { %495 = shalt.err (!%p492_p2)
}
  0x22   : > { %s496_s28 = scalar_lea.vmem %s690_s8, 128  ;;  %s595_s29 = smov [#allocation2]  }
  0x23   : > { %p497_p3 = scmp.ne.s32.totalorder %s690_s8, %s496_s28  ;;  %s501_s30 = sshll.u32 %s595_s29, 4  ;;  %s502_s30 = int_to_ptr.vmem [resolvable:$false] %s501_s30 }
  0x24   : > { %s503_s4 = scalar_lea.vmem %s502_s30, 256  ;;  %p504_p9 = scmp.lt.s32.totalorder %s690_s8, %s502_s30 }
  0x25   : > { %p499_p6 = pnand %p497_p3, %p483_p5  ;;  %p505_p4 = scmp.lt.s32.totalorder %s503_s4, %s496_s28 }
  0x27   : > { %p500_p11 = pneg %p499_p6  ;;  %p506_p10 = por %p505_p4, %p504_p9 }
  0x29   : > { %p507_p12 = pnand %p506_p10, %p500_p11 }
  0x2b   : > { %510 = shalt.err (!%p507_p12)
}
  0x2c   : > { %418 = dma.hbm_to_vmem [thread:$0]  (!%p694_p0), %s688_s6, 128, %s690_s8, %s154_s10  }
  0x2d   : > { %p815_p1 = scmp.lt.s32.totalorder %s593_s17, 3  ;;  %p816_p2 = scmp.ge.s32.totalorder %s593_s17, 1 }
  0x2f   : > { %p173_p5 = pnand %p816_p2, %p815_p1 }
  0x30   : > { %s730_s5 = sand.u32 (!%p173_p5), 1, %s577_s13  }
  0x31   : > { %176 = sbr.rel (%p173_p5) target bundleno = 211 (0xd3), region = 32  ;;  %s402_s7 = sshll.u32 (!%p173_p5), %s730_s5, 3 }
  0x32   : > { %s179_s11 = scalar_lea.sflag (!%p173_p5), [#allocation3], %s730_s5  ;;  %s182_s9 = scalar_lea.vmem (!%p173_p5), [#allocation2], %s402_s7 }
  0x38   : > { %564 = dma.done.wait (%p666_p8), %s179_s11, 128  }
  0x39   : > { %566 = vsyncadd (%p666_p8), %s179_s11, 4294967168  ;;  %v596_v0 = vmov 0   ;;  %v263_v1 = vld [vmem:[%s806_s1] sm:$0xf]  ;;  %vm211_vm0 = vcmask 1043456   ;;  %v272_v45 = vlaneseq  ;;  %s410_s24 = sshll.u32 %s585_s15, 7 }
  0x3a   : > { %475 = vset.pattern.permute.xlu0 %v596_v0  ;;  %v264_v2 = vld [vmem:[%s807_s2] sm:$0xf]  ;;  %v597_v43 = vmov 839922192   ;;  %s204_s19 = scalar_lea.vmem [#allocation5], %s402_s7  ;;  %s756_s28 = scalar_lea.hbm %s808_s3, %s410_s24 }
  0x3b   : > { %267 = vperm.xlu0 %475, %v263_v1   ;;  %v207_v3 = vld [vmem:[%s182_s9] sm:$0xff]  ;;  %v270_v44 = vunpack.c.l.s4 %v597_v43  ;;  %v273_v48 = vshrl.u32 %v272_v45, 7  ;;  %s310_s21 = sshll.u32 %s204_s19, 4  ;;  %s294_s29 = scalar_lea.sflag [#allocation4], %s730_s5  ;;  %s758_s21 = int_to_ptr.vmem [resolvable:$true] %s310_s21 }
  0x3c   : > { %v209_v4 = vcombine.high %v207_v3, %v207_v3  ;;  %v212_v5 = vsel %vm211_vm0, %v207_v3, 0.0  ;;  %s511_s30 = scalar_lea.vmem %s758_s21, 128  ;;  %p817_p9 = scmp.ne.s32.totalorder %s812_s25, 0 }
  0x3d   : > { %v213_v7 = vrot.slane %v212_v5, 4  ;;  %v271_v47 = vunpack.c.0.s8 %v270_v44  ;;  %p512_p8 = scmp.ne.s32.totalorder %s758_s21, %s511_s30  ;;  %s598_s15 = smov [#allocation5]  }
  0x3e   : > { %v219_v6 = vsel %vm211_vm0, %v209_v4, 0.0  ;;  %s515_s4 = sshll.u32 %s598_s15, 4  ;;  %s516_s4 = int_to_ptr.vmem [resolvable:$false] %s515_s4 }
  0x3f   : > { %280 = vperm.xlu0 %475, %v264_v2   ;;  %v220_v8 = vrot.slane %v219_v6, 4  ;;  %v214_v9 = vadd.f32 %v213_v7, %v212_v5  ;;  %v274_v50 = vsub.s32 %v271_v47, %v273_v48  ;;  %p513_p11 = pnand %p512_p8, %p817_p9  ;;  %s517_s7 = scalar_lea.vmem %s516_s4, 256 }
  0x40   : > { %p518_p7 = scmp.lt.s32.totalorder %s758_s21, %s516_s4  ;;  %p519_p13 = scmp.lt.s32.totalorder %s517_s7, %s511_s30 }
  0x41   : > { %v221_v10 = vadd.f32 %v220_v8, %v219_v6  ;;  %v215_v11 = vrot.slane %v214_v9, 2  ;;  %p514_p0 = pneg %p513_p11 }
  0x42   : > { %p520_p3 = por %p519_p13, %p518_p7 }
  0x43   : > { %v222_v12 = vrot.slane %v221_v10, 2  ;;  %v216_v13 = vadd.f32 %v215_v11, %v214_v9 }
  0x44   : > { %p521_p6 = pnand %p520_p3, %p514_p0 }
  0x45   : > { %v223_v14 = vadd.f32 %v222_v12, %v221_v10  ;;  %v217_v15 = vrot.slane %v216_v13, 1 }
  0x47   : > { %v224_v16 = vrot.slane %v223_v14, 1  ;;  %v218_v17 = vadd.f32 %v217_v15, %v216_v13 }
  0x49   : > { %v225_v18 = vadd.f32 %v224_v16, %v223_v14  ;;  %v227_v19 = vmul.f32 0.25, %v218_v17 }
  0x4b   : > { %v228_v20 = vmul.f32 0.25, %v225_v18 }
  0x4d   : > { %v231_v21 = vcombine.low %v227_v19, %v228_v20 }
  0x4f   : > { %v233_v22 = vsub.f32 %v207_v3, %v231_v21 }
  0x51   : > { %v234_v23 = vmul.f32 %v233_v22, %v233_v22 }
  0x53   : > { %v236_v24 = vcombine.high %v234_v23, %v234_v23  ;;  %v238_v25 = vsel %vm211_vm0, %v234_v23, 0.0 }
  0x54   : > { %v239_v27 = vrot.slane %v238_v25, 4 }
  0x55   : > { %v245_v26 = vsel %vm211_vm0, %v236_v24, 0.0 }
  0x56   : > { %v246_v28 = vrot.slane %v245_v26, 4  ;;  %v240_v29 = vadd.f32 %v239_v27, %v238_v25 }
  0x58   : > { %v247_v30 = vadd.f32 %v246_v28, %v245_v26  ;;  %v241_v31 = vrot.slane %v240_v29, 2 }
  0x5a   : > { %v248_v32 = vrot.slane %v247_v30, 2  ;;  %v242_v33 = vadd.f32 %v241_v31, %v240_v29 }
  0x5c   : > { %v249_v34 = vadd.f32 %v248_v32, %v247_v30  ;;  %v243_v35 = vrot.slane %v242_v33, 1 }
  0x5e   : > { %v250_v36 = vrot.slane %v249_v34, 1  ;;  %v244_v37 = vadd.f32 %v243_v35, %v242_v33 }
  0x60   : > { %v251_v38 = vadd.f32 %v250_v36, %v249_v34  ;;  %v252_v39 = vmul.f32 0.25, %v244_v37 }
  0x62   : > { %v253_v40 = vmul.f32 0.25, %v251_v38  ;;  %v254_v41 = vadd.f32 1e-05, %v252_v39 }
  0x64   : > { %v255_v42 = vadd.f32 1e-05, %v253_v40  ;;  %477 = vrsqrt.f32 %v254_v41 }
  0x66   : > { %479 = vrsqrt.f32 %v255_v42 }
  0x6e   : > { %v478_v46 = vpop.eup %477 }
  0x70   : > { %v480_v49 = vpop.eup %479 }
  0x71   : > { %v260_v51 = vcombine.low %v478_v46, %v480_v49 }
  0x73   : > { %v262_v53 = vmul.f32 %v260_v51, %v233_v22 }
  0xba   : > { %v268_v52 = vpop.permute.xlu0 %267 }
  0xbb   : > { %v275_v54 = vrot.slane %v268_v52, %v274_v50 }
  0xbd   : > { %v277_v56 = vmul.f32 %v275_v54, %v262_v53 }
  0xbe   : > { %v281_v55 = vpop.permute.xlu0 %280 }
  0xbf   : > { %v288_v57 = vrot.slane %v281_v55, %v274_v50 }
  0xc1   : > { %v290_v58 = vadd.f32 %v288_v57, %v277_v56 }
  0xc3   : > { %v291_v59 = vmax.f32 %v290_v58, 0.0 }
  0xc5   : > { %292 = vst [vmem:[%s204_s19] sm:$0xff] %v291_v59 }
  0xc6   : > { %524 = shalt.err (!%p521_p6)
}
  0xc7   : > { %s525_s5 = scalar_lea.hbm %s756_s28, 128  ;;  %s529_s6 = scalar_lea.hbm %s808_s3, 256 }
  0xc8   : > { %p526_p4 = scmp.ne.s32.totalorder %s756_s28, %s525_s5  ;;  %p530_p1 = scmp.lt.u32.totalorder %s756_s28, %s808_s3 }
  0xc9   : > { %p531_p2 = scmp.lt.u32.totalorder %s529_s6, %s525_s5  ;;  %p533_p8 = scmp.lt.u32.totalorder %s525_s5, %s756_s28 }
  0xca   : > { %p527_p10 = pnand %p526_p4, %p817_p9 }
  0xcb   : > { %p532_p5 = por %p531_p2, %p530_p1 }
  0xcc   : > { %p528_p12 = pneg %p527_p10 }
  0xcd   : > { %p534_p11 = por %p533_p8, %p532_p5 }
  0xcf   : > { %p535_p0 = pnand %p534_p11, %p528_p12 }
  0xd1   : > { %538 = shalt.err (!%p535_p0)
}
  0xd2   : > { %413 = dma.vmem_to_hbm [thread:$0]  (%p817_p9), %s758_s21, 128, %s756_s28, %s294_s29  }
  0xd3 PF: > { %s322_s18 = sand.u32 1, %s573_s12   ;;  %p818_p7 = scmp.ne.s32.totalorder %s813_s27, 0 }
  0xd4   : > { %p819_p13 = scmp.ge.s32.totalorder %s593_s17, 2  ;;  %s323_s24 = scalar_lea.sflag [#allocation4], %s322_s18 }
  0xd6   : > { %p420_p3 = pnand %p819_p13, %p818_p7 }
  0xd8   : > { %568 = dma.done.wait (!%p420_p3), %s323_s24, 128  }
  0xd9   : > { %570 = vsyncadd (!%p420_p3), %s323_s24, 4294967168  ;;  %s19_s17 = sadd.s32 1, %s593_s17   ;;  %s820_s12 = smov %s577_s13 }
  0xda   : > { %p16_p6 = scmp.ge.s32.totalorder %s19_s17, 4   ;;  %s821_s13 = smov %s581_s14 }
  0xdb   : > { %s822_s14 = smov %s675_s26  ;;  %s823_s15 = smov %s589_s16 }
  0xdc   : > { %s824_s16 = smov %s826_s20  ;;  %18 = sbr.rel (!%p16_p6) target bundleno = 6 (0x6), region = 77 }
  0xe3   :  { %328 = vsyncpa [#allocation3], 1 }
  0xe4   :  { %330 = vsyncpa [#allocation3 + $0x1], 1 }
  0xe5   :  { %331 = vsyncpa [#allocation4], 1 }
  0xe6   :  { %333 = vsyncpa [#allocation4 + $0x1], 1 }

</bundles_post_ra>
